<compile_context>
chip_gen: v7x
topology: tpu7x:2x2x1
jax: 0.10.0
libtpu: 0.0.40
codegen_flags: <defaults>
</compile_context>

<pallas_src>
import jax
import jax.numpy as jnp
from jax.experimental import pallas as pl
from jax.experimental.pallas import tpu as pltpu


def _round_up(x, m):
    return ((x + m - 1) // m) * m


def _im2col_nchw(x, k, pad):
    """NCHW -> (B, H*W, C*k*k) patches, channel-major within each patch
    (matches torch's weight.reshape(F, C*K*K) flattening)."""
    B, C, H, W = x.shape
    xp = jnp.pad(x, ((0, 0), (0, 0), (pad, pad), (pad, pad)))
    cols = [xp[:, :, ky:ky + H, kx:kx + W] for ky in range(k) for kx in range(k)]
    patches = jnp.stack(cols, axis=2)            # (B, C, k*k, H, W)
    patches = patches.transpose(0, 3, 4, 1, 2)   # (B, H, W, C, k*k)
    return patches.reshape(B, H * W, C * k * k)


# ----------------------------- fused Pallas kernel ---------------------------

def _make_kernel(hw_total):
    inv_hw = 1.0 / float(hw_total)

    def kernel(patches_ref, wc_ref, bc_ref, w1_ref, b1_ref, w2_ref, b2_ref,
               o_ref, pool_acc):
        r = pl.program_id(1)                       # row-tile (reduction) axis

        @pl.when(r == 0)
        def _init():
            pool_acc[...] = jnp.zeros_like(pool_acc)

        # conv lowered to matmul on this row tile, fused bias + ReLU (MXU + VPU)
        p = patches_ref[0]                                       # (T, CKKp) bf16
        h = jnp.dot(p, wc_ref[...], preferred_element_type=jnp.float32)
        h = jnp.maximum(h + bc_ref[...], 0.0)                    # (T, Fp) f32

        # global-average-pool partial sum on the MXU: (8,T) ones @ (T,Fp)
        # (8 identical rows -> sublane-full feats tile for the projector)
        ones = jnp.ones((8, p.shape[0]), dtype=jnp.bfloat16)
        pool_acc[...] += jnp.dot(ones, h.astype(jnp.bfloat16),
                                 preferred_element_type=jnp.float32)

        # last row tile of this image: finish pooling + projector MLP
        @pl.when(r == pl.num_programs(1) - 1)
        def _final():
            feats = pool_acc[...] * inv_hw                       # (8, Fp) f32
            z = jnp.dot(feats.astype(jnp.bfloat16), w1_ref[...],
                        preferred_element_type=jnp.float32) + b1_ref[...]
            z = jnp.maximum(z, 0.0)                              # (8, HIDp)
            out = jnp.dot(z.astype(jnp.bfloat16), w2_ref[...],
                          preferred_element_type=jnp.float32) + b2_ref[...]
            o_ref[0] = out                                       # (8, PROJp)

    return kernel


# --------------------------------- wrapper -----------------------------------

def simclr_forward(x, params):
    """Forward pass of SimCLRModel: projector(encoder(x)) in one fused kernel."""
    B, C, H, W = x.shape
    wc, bc, w1, b1, w2, b2 = (params["conv_w"], params["conv_b"],
                              params["fc1_w"], params["fc1_b"],
                              params["fc2_w"], params["fc2_b"])
    F, K = wc.shape[0], wc.shape[2]
    HID, PROJ = w1.shape[1], w2.shape[1]
    hw = H * W
    ckk = C * K * K

    # (8,128)-friendly padded sizes (lane-dense operands & outputs).
    ckk_p = _round_up(ckk, 128)
    f_p = _round_up(F, 128)
    hid_p = _round_up(HID, 128)
    proj_p = _round_up(PROJ, 128)

    # Row tiling inside each image.  128 keeps the multi-tile reduction path
    # exercised at demo size; for production inputs raise toward 512-1024 rows
    # (halve on v7x: 64 MiB VMEM, set vmem_limit_bytes; v5e scoped default 16 MiB).
    tile_hw = 128 if hw % 128 == 0 else hw
    n_row_tiles = hw // tile_hw

    # im2col + zero-pad contraction dim; bf16 MXU inputs, f32 accumulation.
    patches = _im2col_nchw(x, k=K, pad=K // 2)                   # (B, HW, CKK)
    patches = jnp.pad(patches, ((0, 0), (0, 0), (0, ckk_p - ckk)))
    patches = patches.astype(jnp.bfloat16)

    wc_mat = jnp.pad(wc.reshape(F, ckk).T,
                     ((0, ckk_p - ckk), (0, f_p - F))).astype(jnp.bfloat16)
    bc_row = jnp.pad(bc, (0, f_p - F)).reshape(1, f_p)           # f32
    w1_p = jnp.pad(w1, ((0, f_p - F), (0, hid_p - HID))).astype(jnp.bfloat16)
    b1_p = jnp.pad(b1, (0, hid_p - HID)).reshape(1, hid_p)       # f32
    w2_p = jnp.pad(w2, ((0, hid_p - HID), (0, proj_p - PROJ))).astype(jnp.bfloat16)
    b2_p = jnp.pad(b2, (0, proj_p - PROJ)).reshape(1, proj_p)    # f32

    const = lambda b, r: (0, 0)

    out_padded = pl.pallas_call(
        _make_kernel(hw),
        out_shape=jax.ShapeDtypeStruct((B, 8, proj_p), jnp.float32),
        grid_spec=pltpu.PrefetchScalarGridSpec(
            num_scalar_prefetch=0,
            grid=(B, n_row_tiles),
            in_specs=[
                pl.BlockSpec((1, tile_hw, ckk_p), lambda b, r: (b, r, 0)),
                pl.BlockSpec((ckk_p, f_p), const),
                pl.BlockSpec((1, f_p), const),
                pl.BlockSpec((f_p, hid_p), const),
                pl.BlockSpec((1, hid_p), const),
                pl.BlockSpec((hid_p, proj_p), const),
                pl.BlockSpec((1, proj_p), const),
            ],
            out_specs=pl.BlockSpec((1, 8, proj_p), lambda b, r: (b, 0, 0)),
            scratch_shapes=[pltpu.VMEM((8, f_p), jnp.float32)],
        ),
        compiler_params=pltpu.CompilerParams(
            dimension_semantics=("parallel", "arbitrary")),
    )(patches, wc_mat, bc_row, w1_p, b1_p, w2_p, b2_p)

    # Rows 0..7 of each batch slice are identical; take row 0, drop padding cols.
    return out_padded[:, 0, :PROJ]


# ----------------------------- reference (JAX) -------------------------------

def simclr_reference(x, params):
    wc, bc, w1, b1, w2, b2 = (params["conv_w"], params["conv_b"],
                              params["fc1_w"], params["fc1_b"],
                              params["fc2_w"], params["fc2_b"])
    y = jax.lax.conv_general_dilated(
        x, wc, window_strides=(1, 1), padding="SAME",
        dimension_numbers=("NCHW", "OIHW", "NCHW"))
    y = jnp.maximum(y + bc[None, :, None, None], 0.0)
    feats = jnp.mean(y, axis=(2, 3))                             # (B, F)
    z = jnp.maximum(feats @ w1 + b1, 0.0)
    return z @ w2 + b2


# ---------------------------------- main --------------------------------------

if __name__ == "__main__":
    B, C, H, W = 2, 4, 16, 16
    F, HID, PROJ = 32, 64, 32

    key = jax.random.PRNGKey(0)
    k_x, k_cw, k_cb, k_w1, k_b1, k_w2, k_b2 = jax.random.split(key, 7)

    x = jax.random.normal(k_x, (B, C, H, W), dtype=jnp.float32)

    params = {
        "conv_w": jax.random.normal(k_cw, (F, C, 3, 3), jnp.float32) * 0.1,
        "conv_b": jax.random.normal(k_cb, (F,), jnp.float32) * 0.1,
        "fc1_w": jax.random.normal(k_w1, (F, HID), jnp.float32) * 0.1,
        "fc1_b": jax.random.normal(k_b1, (HID,), jnp.float32) * 0.1,
        "fc2_w": jax.random.normal(k_w2, (HID, PROJ), jnp.float32) * 0.1,
        "fc2_b": jax.random.normal(k_b2, (PROJ,), jnp.float32) * 0.1,
    }

    out = jax.jit(simclr_forward)(x, params)
    out = jax.block_until_ready(out)

    ref = simclr_reference(x, params)
    assert out.shape == (B, PROJ), out.shape
    # bf16 MXU inputs with f32 accumulation: expect O(1e-3) abs error at these scales.
    err = float(jnp.max(jnp.abs(out - ref)))
    assert err < 5e-2, err

    print("KERNEL_OK")
</pallas_src>

<mosaic_0001>
module attributes {stable_mosaic.version = 11 : i64} {
  func.func @kernel(%arg0: i32, %arg1: i32, %arg2: memref<1x128x128xbf16, #tpu.memory_space<vmem>>, %arg3: memref<128x128xbf16, #tpu.memory_space<vmem>>, %arg4: memref<1x128xf32, #tpu.memory_space<vmem>>, %arg5: memref<128x128xbf16, #tpu.memory_space<vmem>>, %arg6: memref<1x128xf32, #tpu.memory_space<vmem>>, %arg7: memref<128x128xbf16, #tpu.memory_space<vmem>>, %arg8: memref<1x128xf32, #tpu.memory_space<vmem>>, %arg9: memref<1x8x128xf32, #tpu.memory_space<vmem>>, %arg10: memref<8x128xf32, #tpu.memory_space<vmem>>) attributes {dimension_semantics = [#tpu.dimension_semantics<parallel>, #tpu.dimension_semantics<arbitrary>], iteration_bounds = array<i64: 2, 2>, scalar_prefetch = 0 : i64, scratch_operands = 1 : i64, tpu.core_type = #tpu.core_type<tc>, window_params = [{transform_indices = @transform_0, window_bounds = array<i64: 1, 128, 128>}, {pipeline_mode = #tpu.pipeline_mode<synchronous>, transform_indices = @transform_1, window_bounds = array<i64: 128, 128>}, {pipeline_mode = #tpu.pipeline_mode<synchronous>, transform_indices = @transform_2, window_bounds = array<i64: 1, 128>}, {pipeline_mode = #tpu.pipeline_mode<synchronous>, transform_indices = @transform_3, window_bounds = array<i64: 128, 128>}, {pipeline_mode = #tpu.pipeline_mode<synchronous>, transform_indices = @transform_4, window_bounds = array<i64: 1, 128>}, {pipeline_mode = #tpu.pipeline_mode<synchronous>, transform_indices = @transform_5, window_bounds = array<i64: 128, 128>}, {pipeline_mode = #tpu.pipeline_mode<synchronous>, transform_indices = @transform_6, window_bounds = array<i64: 1, 128>}, {transform_indices = @transform_7, window_bounds = array<i64: 1, 8, 128>}]} {
    %c0_i32 = arith.constant 0 : i32
    %0 = arith.cmpi eq, %arg1, %c0_i32 : i32
    %1 = arith.extui %0 : i1 to i32
    %c0_i32_0 = arith.constant 0 : i32
    %2 = arith.cmpi ne, %1, %c0_i32_0 : i32
    scf.if %2 {
      %cst_15 = arith.constant 0.000000e+00 : f32
      %21 = vector.broadcast %cst_15 : f32 to vector<8x128xf32>
      %c0_16 = arith.constant 0 : index
      %c0_17 = arith.constant 0 : index
      %22 = vector.load %arg10[%c0_16, %c0_17] : memref<8x128xf32, #tpu.memory_space<vmem>>, vector<8x128xf32>
      tpu.vector_store %arg10[%c0_16, %c0_17], %21 {strides = array<i32>} : memref<8x128xf32, #tpu.memory_space<vmem>>, vector<8x128xf32>,
    } else {
    }
    %c0 = arith.constant 0 : index
    %c0_1 = arith.constant 0 : index
    %c0_2 = arith.constant 0 : index
    %3 = vector.load %arg2[%c0, %c0_1, %c0_2] : memref<1x128x128xbf16, #tpu.memory_space<vmem>>, vector<1x128x128xbf16>
    %4 = vector.shape_cast %3 : vector<1x128x128xbf16> to vector<128x128xbf16>
    %c0_3 = arith.constant 0 : index
    %c0_4 = arith.constant 0 : index
    %5 = vector.load %arg3[%c0_3, %c0_4] : memref<128x128xbf16, #tpu.memory_space<vmem>>, vector<128x128xbf16>
    %cst = arith.constant dense<0.000000e+00> : vector<128x128xf32>
    %6 = tpu.matmul %4, %5, %cst {dimension_numbers = #tpu.dot_dimension_numbers<[1], [0], [0], [1], [0, 0, 1, 1], [], []>} : vector<128x128xbf16>, vector<128x128xbf16>, vector<128x128xf32> -> vector<128x128xf32>
    %c0_5 = arith.constant 0 : index
    %c0_6 = arith.constant 0 : index
    %7 = vector.load %arg4[%c0_5, %c0_6] : memref<1x128xf32, #tpu.memory_space<vmem>>, vector<1x128xf32>
    %8 = vector.broadcast %7 : vector<1x128xf32> to vector<128x128xf32>
    %9 = arith.addf %6, %8 : vector<128x128xf32>
    %cst_7 = arith.constant 0.000000e+00 : f32
    %10 = vector.broadcast %cst_7 : f32 to vector<128x128xf32>
    %11 = arith.maximumf %9, %10 : vector<128x128xf32>
    %cst_8 = arith.constant 1.000000e+00 : bf16
    %12 = vector.broadcast %cst_8 : bf16 to vector<8x128xbf16>
    %c0_9 = arith.constant 0 : index
    %c0_10 = arith.constant 0 : index
    %13 = vector.load %arg10[%c0_9, %c0_10] : memref<8x128xf32, #tpu.memory_space<vmem>>, vector<8x128xf32>
    %14 = arith.truncf %11 : vector<128x128xf32> to vector<128x128xbf16>
    %cst_11 = arith.constant dense<0.000000e+00> : vector<8x128xf32>
    %15 = tpu.matmul %12, %14, %cst_11 {dimension_numbers = #tpu.dot_dimension_numbers<[1], [0], [0], [1], [0, 0, 1, 1], [], []>} : vector<8x128xbf16>, vector<128x128xbf16>, vector<8x128xf32> -> vector<8x128xf32>
    %16 = arith.addf %13, %15 : vector<8x128xf32>
    %c0_12 = arith.constant 0 : index
    %c0_13 = arith.constant 0 : index
    %17 = vector.load %arg10[%c0_12, %c0_13] : memref<8x128xf32, #tpu.memory_space<vmem>>, vector<8x128xf32>
    tpu.vector_store %arg10[%c0_12, %c0_13], %16 {strides = array<i32>} : memref<8x128xf32, #tpu.memory_space<vmem>>, vector<8x128xf32>,
    %c1_i32 = arith.constant 1 : i32
    %18 = arith.cmpi eq, %arg1, %c1_i32 : i32
    %19 = arith.extui %18 : i1 to i32
    %c0_i32_14 = arith.constant 0 : i32
    %20 = arith.cmpi ne, %19, %c0_i32_14 : i32
    scf.if %20 {
      %c0_15 = arith.constant 0 : index
      %c0_16 = arith.constant 0 : index
      %21 = vector.load %arg10[%c0_15, %c0_16] : memref<8x128xf32, #tpu.memory_space<vmem>>, vector<8x128xf32>
      %cst_17 = arith.constant 3.906250e-03 : f32
      %22 = vector.broadcast %cst_17 : f32 to vector<8x128xf32>
      %23 = arith.mulf %21, %22 : vector<8x128xf32>
      %24 = arith.truncf %23 : vector<8x128xf32> to vector<8x128xbf16>
      %c0_18 = arith.constant 0 : index
      %c0_19 = arith.constant 0 : index
      %25 = vector.load %arg5[%c0_18, %c0_19] : memref<128x128xbf16, #tpu.memory_space<vmem>>, vector<128x128xbf16>
      %cst_20 = arith.constant dense<0.000000e+00> : vector<8x128xf32>
      %26 = tpu.matmul %24, %25, %cst_20 {dimension_numbers = #tpu.dot_dimension_numbers<[1], [0], [0], [1], [0, 0, 1, 1], [], []>} : vector<8x128xbf16>, vector<128x128xbf16>, vector<8x128xf32> -> vector<8x128xf32>
      %c0_21 = arith.constant 0 : index
      %c0_22 = arith.constant 0 : index
      %27 = vector.load %arg6[%c0_21, %c0_22] : memref<1x128xf32, #tpu.memory_space<vmem>>, vector<1x128xf32>
      %28 = vector.broadcast %27 : vector<1x128xf32> to vector<8x128xf32>
      %29 = arith.addf %26, %28 : vector<8x128xf32>
      %cst_23 = arith.constant 0.000000e+00 : f32
      %30 = vector.broadcast %cst_23 : f32 to vector<8x128xf32>
      %31 = arith.maximumf %29, %30 : vector<8x128xf32>
      %32 = arith.truncf %31 : vector<8x128xf32> to vector<8x128xbf16>
      %c0_24 = arith.constant 0 : index
      %c0_25 = arith.constant 0 : index
      %33 = vector.load %arg7[%c0_24, %c0_25] : memref<128x128xbf16, #tpu.memory_space<vmem>>, vector<128x128xbf16>
      %cst_26 = arith.constant dense<0.000000e+00> : vector<8x128xf32>
      %34 = tpu.matmul %32, %33, %cst_26 {dimension_numbers = #tpu.dot_dimension_numbers<[1], [0], [0], [1], [0, 0, 1, 1], [], []>} : vector<8x128xbf16>, vector<128x128xbf16>, vector<8x128xf32> -> vector<8x128xf32>
      %c0_27 = arith.constant 0 : index
      %c0_28 = arith.constant 0 : index
      %35 = vector.load %arg8[%c0_27, %c0_28] : memref<1x128xf32, #tpu.memory_space<vmem>>, vector<1x128xf32>
      %36 = vector.broadcast %35 : vector<1x128xf32> to vector<8x128xf32>
      %37 = arith.addf %34, %36 : vector<8x128xf32>
      %c0_29 = arith.constant 0 : index
      %c0_30 = arith.constant 0 : index
      %c0_31 = arith.constant 0 : index
      %38 = vector.load %arg9[%c0_29, %c0_30, %c0_31] : memref<1x8x128xf32, #tpu.memory_space<vmem>>, vector<1x8x128xf32>
      %39 = vector.shape_cast %38 : vector<1x8x128xf32> to vector<8x128xf32>
      %40 = vector.shape_cast %37 : vector<8x128xf32> to vector<1x8x128xf32>
      tpu.vector_store %arg9[%c0_29, %c0_30, %c0_31], %40 {strides = array<i32>} : memref<1x8x128xf32, #tpu.memory_space<vmem>>, vector<1x8x128xf32>,
    } else {
    }
    return
  }
  func.func @transform_0(%arg0: i32, %arg1: i32) -> (i32, i32, i32) {
    %c0_i32 = arith.constant 0 : i32
    %c0_i32_0 = arith.constant 0 : i32
    return %arg0, %arg1, %c0_i32 : i32, i32, i32
  }
  func.func @transform_1(%arg0: i32, %arg1: i32) -> (i32, i32) {
    %c0_i32 = arith.constant 0 : i32
    %c0_i32_0 = arith.constant 0 : i32
    %c0_i32_1 = arith.constant 0 : i32
    return %c0_i32, %c0_i32_0 : i32, i32
  }
  func.func @transform_2(%arg0: i32, %arg1: i32) -> (i32, i32) {
    %c0_i32 = arith.constant 0 : i32
    %c0_i32_0 = arith.constant 0 : i32
    %c0_i32_1 = arith.constant 0 : i32
    return %c0_i32, %c0_i32_0 : i32, i32
  }
  func.func @transform_3(%arg0: i32, %arg1: i32) -> (i32, i32) {
    %c0_i32 = arith.constant 0 : i32
    %c0_i32_0 = arith.constant 0 : i32
    %c0_i32_1 = arith.constant 0 : i32
    return %c0_i32, %c0_i32_0 : i32, i32
  }
  func.func @transform_4(%arg0: i32, %arg1: i32) -> (i32, i32) {
    %c0_i32 = arith.constant 0 : i32
    %c0_i32_0 = arith.constant 0 : i32
    %c0_i32_1 = arith.constant 0 : i32
    return %c0_i32, %c0_i32_0 : i32, i32
  }
  func.func @transform_5(%arg0: i32, %arg1: i32) -> (i32, i32) {
    %c0_i32 = arith.constant 0 : i32
    %c0_i32_0 = arith.constant 0 : i32
    %c0_i32_1 = arith.constant 0 : i32
    return %c0_i32, %c0_i32_0 : i32, i32
  }
  func.func @transform_6(%arg0: i32, %arg1: i32) -> (i32, i32) {
    %c0_i32 = arith.constant 0 : i32
    %c0_i32_0 = arith.constant 0 : i32
    %c0_i32_1 = arith.constant 0 : i32
    return %c0_i32, %c0_i32_0 : i32, i32
  }
  func.func @transform_7(%arg0: i32, %arg1: i32) -> (i32, i32, i32) {
    %c0_i32 = arith.constant 0 : i32
    %c0_i32_0 = arith.constant 0 : i32
    %c0_i32_1 = arith.constant 0 : i32
    return %arg0, %c0_i32, %c0_i32_0 : i32, i32, i32
  }
}

</mosaic_0001>

<bundles_post_ra>
// kernel: simclr_forward.1
= control target key start
LH: loop header
LB: loop body
LE: loop exit
PB: predicated region body
PF: predicated region fallthrough
CT: control target
= control target key end

     0   :  { %s1260_s24 = smov 0   ;;  %s1262_s25 = smov 0   ;;  %s1419_s0 = inlined_call_operand.vmem [shape: bf16[2,256,128], index: 0, kind: input, shape index: {}]   ;;  %s1420_s1 = inlined_call_operand.vmem [shape: bf16[128,128], index: 1, kind: input, shape index: {}]   ;;  %s1421_s2 = inlined_call_operand.vmem [shape: f32[1,128], index: 2, kind: input, shape index: {}]   ;;  %s1422_s3 = inlined_call_operand.vmem [shape: bf16[128,128], index: 3, kind: input, shape index: {}]   ;;  %s1423_s4 = inlined_call_operand.vmem [shape: f32[1,128], index: 4, kind: input, shape index: {}]   ;;  %s1424_s5 = inlined_call_operand.vmem [shape: bf16[128,128], index: 5, kind: input, shape index: {}]   ;;  %s1425_s6 = inlined_call_operand.vmem [shape: f32[1,128], index: 6, kind: input, shape index: {}]   ;;  %s1426_s7 = inlined_call_operand.vmem [shape: f32[2,8,128], index: 7, kind: output, shape index: {}]  }
   0x1   :  { %s1264_s26 = smov 0   ;;  %s1266_s27 = smov 0  }
   0x2   :  { %s1268_s28 = smov 0  }
   0x3 LB: > { %s26_s29 = sadd.s32 1, %s1204_s26  ;;  %s29_s30 = sadd.s32 1, %s1208_s27  ;;  %s1212_s28 = sphi %s1268_s28, %s17_s28   ;;  %s1208_s27 = sphi %s1266_s27, %s1430_s27   ;;  %s1204_s26 = sphi %s1264_s26, %s1429_s26   ;;  %s1200_s25 = sphi %s1262_s25, %s1428_s25   ;;  %s1196_s24 = sphi %s1260_s24, %s1427_s24  }
   0x4   : > { %p27_p0 = scmp.ge.s32.totalorder %s26_s29, 2  ;;  %p917_p1 = scmp.ge.s32.totalorder %s1212_s28, 1 }
   0x5   : > { %p256_p2 = scmp.lt.s32.totalorder %s1212_s28, 5 }
   0x6   : > { %s1432_s29 = smov (%p27_p0, %s26_s29), 0  ;;  %s1434_s30 = smov (!%p27_p0, %s29_s30), %s1208_s27 }
   0x7   : > { %p257_p3 = pnand %p917_p1, %p256_p2  ;;  %p31_p4 = scmp.ge.s32.totalorder %s1434_s30, 2 }
   0x8   : > { %s918_s8 = sshll.u32 (!%p257_p3), %s1196_s24, 4  ;;  %p292_p5 = scmp.lt.s32.totalorder (!%p257_p3), %s1200_s25, 1 }
   0x9   : > { %s1436_s30 = smov (%p31_p4, %s1434_s30), 0  ;;  %260 = sbr.rel (%p257_p3) target bundleno = 970 (0x3ca), region = 48 }
   0xa   : > { %p294_p6 = scmp.lt.s32.totalorder (!%p257_p3), %s918_s8, 31  ;;  %p922_p7 = scmp.ne.s32.totalorder (!%p257_p3), %s1196_s24, 0 }
  0x10   : > { %s1438_s25 = smov (!%p292_p5, %s1200_s25), 1  ;;  %s1440_s8 = smov (!%p294_p6, %s918_s8), 31 }
  0x11   : > { %s919_s9 = sshll.u32 %s1438_s25, 5  ;;  %s921_s10 = sshll.u32 %s1438_s25, 3  ;;  %v1214_v0 = vmov (!%p922_p7), 0.0  }
  0x12   : > { %s297_s11 = sadd.s32 %s919_s9, %s1440_s8  ;;  %s1296_s14 = scalar_lea.vmem %s1426_s7, %s921_s10  ;;  %311 = vst [vmem:[#allocation2] sm:$0xff] (!%p922_p7), %v1214_v0 }
  0x13   : > { %s920_s15 = sshll.u32 %s297_s11, 2  ;;  %310 = sbr.rel (%p922_p7) target bundleno = 26 (0x1a), region = 52 }
  0x14   : > { %s1301_s18 = scalar_lea.vmem %s1419_s0, %s920_s15 }
  0x1a PF: > { %v1142_v1 = vld [vmem:[%s1420_s1] sm:$0xff]   ;;  %v1143_v2 = vld [vmem:[%s1420_s1 + $0x8] sm:$0xff]   ;;  %v1144_v3 = vld [vmem:[%s1420_s1 + $0x10] sm:$0xff]   ;;  %v1215_v17 = vmov 0.0   ;;  %vm1216_vm0 = vmmov 0   ;;  %p940_p8 = scmp.ne.s32.totalorder %s1196_s24, 1 }
  0x1b   : > { %1004 = vmatprep.subr.bf16.mxu0 %v1142_v1  ;;  %v1145_v4 = vld [vmem:[%s1420_s1 + $0x18] sm:$0xff]   ;;  %v1150_v5 = vld [vmem:[%s1301_s18] sm:$0xff]   ;;  %v1147_v7 = vld [vmem:[%s1420_s1 + $0x28] sm:$0xff]   ;;  %1036 = vmatprep.subr.bf16.mxu1 %v1215_v17  ;;  %vm1219_vm1 = vmmov (!%p940_p8), 0  }
  0x1c   : > { %1005 = vmatpush3.bf16.msra.mxu0 %v1142_v1  ;;  %1020 = vmatprep.mubr.bf16.mxu0 %v1150_v5  ;;  %v1146_v6 = vld [vmem:[%s1420_s1 + $0x20] sm:$0xff]   ;;  %v1148_v8 = vld [vmem:[%s1420_s1 + $0x30] sm:$0xff]   ;;  %v1149_v9 = vld [vmem:[%s1420_s1 + $0x38] sm:$0xff]  }
  0x1d   : > { %1006 = vmatprep.subr.bf16.mxu0 %v1143_v2  ;;  %v1151_v10 = vld [vmem:[%s1301_s18 + $0x8] sm:$0xff]   ;;  %v1152_v11 = vld [vmem:[%s1301_s18 + $0x10] sm:$0xff]   ;;  %v1153_v12 = vld [vmem:[%s1301_s18 + $0x18] sm:$0xff]   ;;  %1052 = vmatprep.mubr.msk.bf16.mxu1 %vm1216_vm0, %v1215_v17 }
  0x1e   : > { %v1154_v13 = vld [vmem:[%s1301_s18 + $0x20] sm:$0xff]   ;;  %v1155_v14 = vld [vmem:[%s1301_s18 + $0x28] sm:$0xff]   ;;  %v1156_v15 = vld [vmem:[%s1301_s18 + $0x30] sm:$0xff]  }
  0x1f   : > { %v1157_v16 = vld [vmem:[%s1301_s18 + $0x38] sm:$0xff]   ;;  %v923_v18 = vld [vmem:[%s1421_s2] ss:$0 sm:$0xff] }
  0x20   : > { %1007 = vmatpush3.bf16.msra.mxu0 %v1143_v2 }
  0x21   : > { %1008 = vmatprep.subr.bf16.mxu0 %v1144_v3 }
  0x24   : > { %1009 = vmatpush3.bf16.msra.mxu0 %v1144_v3 }
  0x25   : > { %1010 = vmatprep.subr.bf16.mxu0 %v1145_v4 }
  0x28   : > { %1011 = vmatpush3.bf16.msra.mxu0 %v1145_v4 }
  0x29   : > { %1012 = vmatprep.subr.bf16.mxu0 %v1146_v6 }
  0x2c   : > { %1013 = vmatpush3.bf16.msra.mxu0 %v1146_v6 }
  0x2d   : > { %1014 = vmatprep.subr.bf16.mxu0 %v1147_v7 }
  0x30   : > { %1015 = vmatpush3.bf16.msra.mxu0 %v1147_v7 }
  0x31   : > { %1016 = vmatprep.subr.bf16.mxu0 %v1148_v8 }
  0x34   : > { %1017 = vmatpush3.bf16.msra.mxu0 %v1148_v8 }
  0x35   : > { %1018 = vmatprep.subr.bf16.mxu0 %v1149_v9 }
  0x38   : > { %1019 = vmatpush3.bf16.msra.mxu0 %v1149_v9 }
  0x3b   : > { %1021 = vmatmul.mubr.bf16.vlgmr.msra.gmra.mrb[0].mxu0 %v1151_v10 }
  0x3c   : > { %1024 = vmatprep.mubr.bf16.mxu0 %v1152_v11  ;;  %v1217_v11 = vmov 1065369472  }
  0x43   : > { %1025 = vmatmul.mubr.bf16.gmra.mrb[4].mxu0 %v1153_v12  ;;  %v560_v12 = vld [vmem:[#allocation2] sm:$0xff] }
  0x44   : > { %1028 = vmatprep.mubr.bf16.mxu0 %v1154_v13 }
  0x4b   : > { %1029 = vmatmul.mubr.bf16.gmra.mrb[8].mxu0 %v1155_v14 }
  0x4c   : > { %1032 = vmatprep.mubr.bf16.mxu0 %v1156_v15 }
  0x53   : > { %1033 = vmatmul.mubr.bf16.gmra.mrb[12].mxu0 %v1157_v16 }
 0x10e   : > { %v1022_v19 = vpop.f32.mrb[0].mxu0 }
 0x10f   : > { %v490_v20 = vadd.f32 %v1022_v19, %v923_v18  ;;  %v481_v21 = vpop.f32.mrb[1].mxu0  ;;  %v1158_v19 = vld [vmem:[%s1422_s3] sm:$0xff] (!%p940_p8)  }
 0x110   : > { %v482_v22 = vadd.f32 %v923_v18, %v481_v21  ;;  %v1023_v23 = vpop.f32.mrb[2].mxu0  ;;  %v1160_v21 = vld [vmem:[%s1422_s3 + $0x10] sm:$0xff] (!%p940_p8)  }
 0x111   : > { %v493_v24 = vadd.f32 %v1023_v23, %v923_v18  ;;  %v484_v25 = vpop.f32.mrb[3].mxu0  ;;  %v546_v27 = vmax.f32 %v490_v20, 0.0  ;;  %v1218_v20 = vmov (!%p940_p8), 0.0   ;;  %v1161_v23 = vld [vmem:[%s1422_s3 + $0x18] sm:$0xff] (!%p940_p8)  }
 0x112   : > { %v485_v26 = vadd.f32 %v923_v18, %v484_v25  ;;  %v544_v29 = vmax.f32 %v482_v22, 0.0  ;;  %1056 = vmatprep.subr.bf16.mxu0 (!%p940_p8), %v1218_v20  ;;  %1072 = vmatprep.mubr.msk.bf16.mxu0 (!%p940_p8), %vm1219_vm1, %v1218_v20  ;;  %v1166_v22 = vld [vmem:[%s1424_s5] sm:$0xff] (!%p940_p8)  }
 0x113   : > { %v547_v28 = vmax.f32 %v493_v24, 0.0  ;;  %1057 = vmatpush3.bf16.msra.mxu0 (!%p940_p8), %v1158_v19  ;;  %v1167_v24 = vld [vmem:[%s1424_s5 + $0x8] sm:$0xff] (!%p940_p8)   ;;  %v1162_v25 = vld [vmem:[%s1422_s3 + $0x20] sm:$0xff] (!%p940_p8)  }
 0x114   : > { %v545_v30 = vmax.f32 %v485_v26, 0.0  ;;  %1058 = vmatprep.subr.bf16.mxu0 (!%p940_p8), %v1218_v20  ;;  %v1168_v26 = vld [vmem:[%s1424_s5 + $0x10] sm:$0xff] (!%p940_p8)  }
 0x115   : > { %v562_v31 = vpack.c.bf16 %v547_v28, %v546_v27  ;;  %v1163_v27 = vld [vmem:[%s1422_s3 + $0x28] sm:$0xff] (!%p940_p8)   ;;  %v1169_v28 = vld [vmem:[%s1424_s5 + $0x18] sm:$0xff] (!%p940_p8)  }
 0x116   : > { %v1026_v32 = vpop.f32.mrb[4].mxu0  ;;  %v561_v33 = vpack.c.bf16 %v545_v30, %v544_v29  ;;  %v1164_v29 = vld [vmem:[%s1422_s3 + $0x30] sm:$0xff] (!%p940_p8)  }
 0x117   : > { %v506_v34 = vadd.f32 %v1026_v32, %v923_v18  ;;  %v497_v35 = vpop.f32.mrb[5].mxu0 }
 0x118   : > { %v498_v36 = vadd.f32 %v923_v18, %v497_v35  ;;  %v1027_v37 = vpop.f32.mrb[6].mxu0  ;;  %1037 = vmatpush3.bf16.msra.mxu1 %v561_v33  ;;  %v1165_v33 = vld [vmem:[%s1422_s3 + $0x38] sm:$0xff] (!%p940_p8)  }
 0x119   : > { %v509_v38 = vadd.f32 %v1027_v37, %v923_v18  ;;  %v500_v39 = vpop.f32.mrb[7].mxu0  ;;  %1038 = vmatprep.subr.bf16.mxu1 %v1215_v17  ;;  %v550_v41 = vmax.f32 %v506_v34, 0.0  ;;  %v1171_v34 = vld [vmem:[%s1424_s5 + $0x28] sm:$0xff] (!%p940_p8)   ;;  %v1173_v37 = vld [vmem:[%s1424_s5 + $0x38] sm:$0xff] (!%p940_p8)  }
 0x11a   : > { %v501_v40 = vadd.f32 %v923_v18, %v500_v39  ;;  %v548_v43 = vmax.f32 %v498_v36, 0.0  ;;  %v1172_v36 = vld [vmem:[%s1424_s5 + $0x30] sm:$0xff] (!%p940_p8)  }
 0x11b   : > { %v551_v42 = vmax.f32 %v509_v38, 0.0  ;;  %v941_v38 = vld [vmem:[%s1423_s4] ss:$0 sm:$0xff] (!%p940_p8) }
 0x11c   : > { %v549_v44 = vmax.f32 %v501_v40, 0.0  ;;  %1039 = vmatpush3.bf16.msra.mxu1 %v562_v31  ;;  %v1170_v31 = vld [vmem:[%s1424_s5 + $0x20] sm:$0xff] (!%p940_p8)  }
 0x11d   : > { %v564_v45 = vpack.c.bf16 %v551_v42, %v550_v41  ;;  %1040 = vmatprep.subr.bf16.mxu1 %v1215_v17 }
 0x11e   : > { %v563_v46 = vpack.c.bf16 %v549_v44, %v548_v43  ;;  %v1030_v47 = vpop.f32.mrb[8].mxu0 }
 0x11f   : > { %v522_v48 = vadd.f32 %v1030_v47, %v923_v18  ;;  %v513_v49 = vpop.f32.mrb[9].mxu0 }
 0x120   : > { %v514_v50 = vadd.f32 %v923_v18, %v513_v49  ;;  %v1031_v51 = vpop.f32.mrb[10].mxu0  ;;  %1041 = vmatpush3.bf16.msra.mxu1 %v563_v46  ;;  %v950_v46 = vld [vmem:[%s1425_s6] ss:$0 sm:$0xff] (!%p940_p8) }
 0x121   : > { %v525_v52 = vadd.f32 %v1031_v51, %v923_v18  ;;  %v516_v53 = vpop.f32.mrb[11].mxu0  ;;  %1042 = vmatprep.subr.bf16.mxu1 %v1215_v17  ;;  %v554_v55 = vmax.f32 %v522_v48, 0.0 }
 0x122   : > { %v517_v54 = vadd.f32 %v923_v18, %v516_v53  ;;  %v552_v57 = vmax.f32 %v514_v50, 0.0 }
 0x123   : > { %v555_v56 = vmax.f32 %v525_v52, 0.0 }
 0x124   : > { %v553_v58 = vmax.f32 %v517_v54, 0.0  ;;  %1043 = vmatpush3.bf16.msra.mxu1 %v564_v45 }
 0x125   : > { %v566_v59 = vpack.c.bf16 %v555_v56, %v554_v55  ;;  %1044 = vmatprep.subr.bf16.mxu1 %v1215_v17 }
 0x126   : > { %v565_v60 = vpack.c.bf16 %v553_v58, %v552_v57  ;;  %v1034_v61 = vpop.f32.mrb[12].mxu0 }
 0x127   : > { %v538_v62 = vadd.f32 %v1034_v61, %v923_v18  ;;  %v529_v63 = vpop.f32.mrb[13].mxu0 }
 0x128   : > { %v530_v0 = vadd.f32 %v923_v18, %v529_v63  ;;  %v1035_v1 = vpop.f32.mrb[14].mxu0  ;;  %1045 = vmatpush3.bf16.msra.mxu1 %v565_v60 }
 0x129   : > { %v541_v2 = vadd.f32 %v1035_v1, %v923_v18  ;;  %v532_v3 = vpop.f32.mrb[15].mxu0  ;;  %1046 = vmatprep.subr.bf16.mxu1 %v1215_v17  ;;  %v558_v5 = vmax.f32 %v538_v62, 0.0 }
 0x12a   : > { %v533_v4 = vadd.f32 %v923_v18, %v532_v3  ;;  %v556_v7 = vmax.f32 %v530_v0, 0.0 }
 0x12b   : > { %v559_v6 = vmax.f32 %v541_v2, 0.0 }
 0x12c   : > { %v557_v8 = vmax.f32 %v533_v4, 0.0  ;;  %1047 = vmatpush3.bf16.msra.mxu1 %v566_v59 }
 0x12d   : > { %v568_v9 = vpack.c.bf16 %v559_v6, %v558_v5  ;;  %1048 = vmatprep.subr.bf16.mxu1 %v1215_v17 }
 0x12e   : > { %v567_v10 = vpack.c.bf16 %v557_v8, %v556_v7 }
 0x130   : > { %1049 = vmatpush3.bf16.msra.mxu1 %v567_v10 }
 0x131   : > { %1050 = vmatprep.subr.bf16.mxu1 %v1215_v17  ;;  %v1159_v17 = vld [vmem:[%s1422_s3 + $0x8] sm:$0xff] (!%p940_p8)  }
 0x132   : > { %1059 = vmatpush3.bf16.msra.mxu0 (!%p940_p8), %v1159_v17 }
 0x133   : > { %1060 = vmatprep.subr.bf16.mxu0 (!%p940_p8), %v1218_v20 }
 0x134   : > { %1051 = vmatpush3.bf16.msra.mxu1 %v568_v9 }
 0x135   : > { %1076 = vmatprep.subr.bf16.mxu1 (!%p940_p8), %v1218_v20 }
 0x136   : > { %1061 = vmatpush3.bf16.msra.mxu0 (!%p940_p8), %v1160_v21 }
 0x137   : > { %1053 = vmatmul.mubr.bf16.vlgmr.msra.gmra.mrb[0].mxu1 %v1217_v11  ;;  %1062 = vmatprep.subr.bf16.mxu0 (!%p940_p8), %v1218_v20 }
 0x138   : > { %1092 = vmatprep.mubr.msk.bf16.mxu1 (!%p940_p8), %vm1219_vm1, %v1218_v20  ;;  %1077 = vmatpush3.bf16.msra.mxu1 (!%p940_p8), %v1166_v22 }
 0x139   : > { %1078 = vmatprep.subr.bf16.mxu1 (!%p940_p8), %v1218_v20 }
 0x13a   : > { %1063 = vmatpush3.bf16.msra.mxu0 (!%p940_p8), %v1161_v23 }
 0x13b   : > { %1064 = vmatprep.subr.bf16.mxu0 (!%p940_p8), %v1218_v20 }
 0x13c   : > { %1079 = vmatpush3.bf16.msra.mxu1 (!%p940_p8), %v1167_v24 }
 0x13d   : > { %1080 = vmatprep.subr.bf16.mxu1 (!%p940_p8), %v1218_v20 }
 0x13e   : > { %1065 = vmatpush3.bf16.msra.mxu0 (!%p940_p8), %v1162_v25 }
 0x13f   : > { %1066 = vmatprep.subr.bf16.mxu0 (!%p940_p8), %v1218_v20 }
 0x140   : > { %1081 = vmatpush3.bf16.msra.mxu1 (!%p940_p8), %v1168_v26 }
 0x141   : > { %1082 = vmatprep.subr.bf16.mxu1 (!%p940_p8), %v1218_v20 }
 0x142   : > { %1067 = vmatpush3.bf16.msra.mxu0 (!%p940_p8), %v1163_v27 }
 0x143   : > { %1068 = vmatprep.subr.bf16.mxu0 (!%p940_p8), %v1218_v20 }
 0x144   : > { %1083 = vmatpush3.bf16.msra.mxu1 (!%p940_p8), %v1169_v28 }
 0x145   : > { %1084 = vmatprep.subr.bf16.mxu1 (!%p940_p8), %v1218_v20 }
 0x146   : > { %1069 = vmatpush3.bf16.msra.mxu0 (!%p940_p8), %v1164_v29 }
 0x147   : > { %1070 = vmatprep.subr.bf16.mxu0 (!%p940_p8), %v1218_v20 }
 0x148   : > { %1085 = vmatpush3.bf16.msra.mxu1 (!%p940_p8), %v1170_v31 }
 0x149   : > { %1086 = vmatprep.subr.bf16.mxu1 (!%p940_p8), %v1218_v20 }
 0x14a   : > { %1071 = vmatpush3.bf16.msra.mxu0 (!%p940_p8), %v1165_v33 }
 0x14c   : > { %1087 = vmatpush3.bf16.msra.mxu1 (!%p940_p8), %v1171_v34 }
 0x14d   : > { %1088 = vmatprep.subr.bf16.mxu1 (!%p940_p8), %v1218_v20 }
 0x150   : > { %1089 = vmatpush3.bf16.msra.mxu1 (!%p940_p8), %v1172_v36 }
 0x151   : > { %1090 = vmatprep.subr.bf16.mxu1 (!%p940_p8), %v1218_v20 }
 0x154   : > { %1091 = vmatpush3.bf16.msra.mxu1 (!%p940_p8), %v1173_v37 }
 0x207   : > { %614 = sbr.rel (%p940_p8) target bundleno = 970 (0x3ca), region = 56 }
 0x20a   : > { %v603_v13 = vpop.f32.mrb[0].mxu1 }
 0x20b   : > { %v609_v14 = vadd.f32 %v603_v13, %v560_v12  ;;  %v1054_v15 = vpop.f32.mrb[1].mxu1 }
 0x20c   : > { %v606_v16 = vpop.f32.mrb[2].mxu1 }
 0x20d   : > { %610 = vst [vmem:[#allocation2] sm:$0xff] %v609_v14  ;;  %v1055_v18 = vpop.f32.mrb[3].mxu1 }
 0x214   : > { %v615_v30 = vld [vmem:[#allocation2] sm:$0xff] }
 0x215   : > { %v616_v32 = vmul.f32 0.00390625, %v615_v30 }
 0x217   : > { %v617_v35 = vpack.c.bf16 %v616_v32, %v616_v32 }
 0x219   : > { %1073 = vmatmul.mubr.bf16.vlgmr.msra.gmra.mrb[0].mxu0 %v617_v35 }
 0x2ec   : > { %v723_v39 = vpop.f32.mrb[0].mxu0 }
 0x2ed   : > { %v724_v40 = vadd.f32 %v941_v38, %v723_v39  ;;  %v1074_v41 = vpop.f32.mrb[1].mxu0 }
 0x2ee   : > { %v726_v42 = vpop.f32.mrb[2].mxu0 }
 0x2ef   : > { %v729_v43 = vmax.f32 %v724_v40, 0.0  ;;  %v1075_v44 = vpop.f32.mrb[3].mxu0 }
 0x2f1   : > { %v730_v45 = vpack.c.bf16 %v729_v43, %v729_v43 }
 0x2f3   : > { %1093 = vmatmul.mubr.bf16.vlgmr.msra.gmra.mrb[0].mxu1 %v730_v45 }
 0x3c6   : > { %v836_v47 = vpop.f32.mrb[0].mxu1 }
 0x3c7   : > { %v837_v48 = vadd.f32 %v950_v46, %v836_v47  ;;  %v1094_v49 = vpop.f32.mrb[1].mxu1 }
 0x3c8   : > { %v839_v50 = vpop.f32.mrb[2].mxu1 }
 0x3c9   : > { %842 = vst [vmem:[%s1296_s14] sm:$0xff] %v837_v48  ;;  %v1095_v51 = vpop.f32.mrb[3].mxu1 }
 0x3ca PF: > { %s17_s28 = sadd.s32 1, %s1212_s28   ;;  %s1427_s24 = smov %s1204_s26 }
 0x3cb   : > { %p14_p9 = scmp.ge.s32.totalorder %s17_s28, 6   ;;  %s1428_s25 = smov %s1208_s27 }
 0x3cc   : > { %s1429_s26 = smov %s1432_s29  ;;  %s1430_s27 = smov %s1436_s30 }
 0x3cd   :  { %16 = sbr.rel (!%p14_p9) target bundleno = 3 (0x3), region = 86 }

</bundles_post_ra>
